<compile_context>
chip_gen: v6e
topology: v6e:2x2x1
jax: 0.10.0
libtpu: 0.0.40
codegen_flags: <defaults>
</compile_context>

<pallas_src>
import jax
import jax.numpy as jnp
from jax.experimental import pallas as pl
from jax.experimental.pallas import tpu as pltpu

LANE = 128                                   # TPU lane width: feature dims pad to this
_W1_ROWS = slice(0 * LANE, 1 * LANE)
_W2_ROWS = slice(1 * LANE, 2 * LANE)
_W3_ROWS = slice(2 * LANE, 3 * LANE)
_BIAS_ROWS = slice(3 * LANE, 3 * LANE + 8)   # rows 0..2 of this block = b1,b2,b3
PACKED_ROWS = 3 * LANE + 8                   # 392, multiple of 8 (sublane aligned)


def _round_up(n, m):
    return ((n + m - 1) // m) * m


def mlp_kernel(x_ref, p_ref, o_ref):
    """x_ref: (tb, 128) f32, p_ref: (392, 128) packed params, o_ref: (tb, 128)."""
    x = x_ref[...]                            # f32, lane-padded (padding cols are 0)

    w1 = p_ref[_W1_ROWS, :]                   # (128, 128) zero-padded weights
    w2 = p_ref[_W2_ROWS, :]
    w3 = p_ref[_W3_ROWS, :]
    biases = p_ref[_BIAS_ROWS, :]             # (8, 128); rows 0..2 valid
    b1 = biases[0:1, :]
    b2 = biases[1:2, :]
    b3 = biases[2:3, :]

    # Layer 1: Linear + ReLU (MXU matmul, f32 accumulate; padded lanes stay 0
    # because padded weight columns and bias columns are 0)
    h1 = jnp.dot(x, w1, preferred_element_type=jnp.float32) + b1
    h1 = jnp.maximum(h1, 0.0)

    # Layer 2: Linear + ReLU (padded ROWS of w2 are 0, so padded h1 lanes can't leak)
    h2 = jnp.dot(h1, w2, preferred_element_type=jnp.float32) + b2
    h2 = jnp.maximum(h2, 0.0)

    # Layer 3: Linear -> logits (no activation); lane-dense unmasked store
    logits = jnp.dot(h2, w3, preferred_element_type=jnp.float32) + b3
    o_ref[...] = logits.astype(o_ref.dtype)


def mlp_forward(x, packed_params, feature_dims, *, block_rows=256):
    """feature_dims = (num_inputs, hidden1, hidden2, num_outputs), unpadded."""
    num_inputs, h1, h2, num_outputs = feature_dims
    batch = x.shape[0]

    # Batch tile: multiple of 8 sublanes, capped so tiles stay small even on
    # v7x's 64 MiB VMEM while still allowing deep double-buffering.
    tb = min(block_rows, _round_up(batch, 8))
    padded_batch = _round_up(batch, tb)

    x_pad = jnp.zeros((padded_batch, LANE), jnp.float32)
    x_pad = x_pad.at[:batch, :num_inputs].set(x.astype(jnp.float32))

    grid = (padded_batch // tb,)
    flops = 2 * batch * (num_inputs * h1 + h1 * h2 + h2 * num_outputs)
    bytes_accessed = 4 * (x_pad.size + packed_params.size + padded_batch * LANE)

    out = pl.pallas_call(
        mlp_kernel,
        out_shape=jax.ShapeDtypeStruct((padded_batch, LANE), jnp.float32),
        grid_spec=pl.GridSpec(
            grid=grid,
            in_specs=[
                pl.BlockSpec((tb, LANE), lambda i: (i, 0)),            # x tile
                pl.BlockSpec((PACKED_ROWS, LANE), lambda i: (0, 0)),   # weights resident
            ],
            out_specs=pl.BlockSpec((tb, LANE), lambda i: (i, 0)),
        ),
        compiler_params=pltpu.CompilerParams(
            dimension_semantics=("parallel",),   # shard batch tiles over TCs on v7x
        ),
        cost_estimate=pl.CostEstimate(
            flops=flops, transcendentals=0, bytes_accessed=bytes_accessed),
    )(x_pad, packed_params)

    return out[:batch, :num_outputs]


def init_linear(key, fan_in, fan_out):
    """Deterministic PyTorch-style nn.Linear init: U(-1/sqrt(fan_in), +)."""
    kw, kb = jax.random.split(key)
    bound = 1.0 / jnp.sqrt(jnp.float32(fan_in))
    # stored as (in, out) — transpose of torch's (out, in)
    w = jax.random.uniform(kw, (fan_in, fan_out), jnp.float32, -bound, bound)
    b = jax.random.uniform(kb, (1, fan_out), jnp.float32, -bound, bound)
    return w, b


def make_params(key, num_inputs, num_outputs):
    k1, k2, k3 = jax.random.split(key, 3)
    w1, b1 = init_linear(k1, num_inputs, 30)
    w2, b2 = init_linear(k2, 30, 20)
    w3, b3 = init_linear(k3, 20, num_outputs)
    return (w1, b1, w2, b2, w3, b3)


def pack_params(params):
    """Zero-pad each layer to (128,128)/(1,128) and pack into one (392,128) buffer.

    Padded bias columns are zero, so ReLU of padded lanes is 0 and (because the
    next layer's padded weight ROWS are also zero) never leaks into later layers.
    """
    w1, b1, w2, b2, w3, b3 = params

    def pad_w(w):
        return jnp.pad(w.astype(jnp.float32),
                       ((0, LANE - w.shape[0]), (0, LANE - w.shape[1])))

    bias_blk = jnp.zeros((8, LANE), jnp.float32)
    bias_blk = bias_blk.at[0, : b1.shape[1]].set(b1[0].astype(jnp.float32))
    bias_blk = bias_blk.at[1, : b2.shape[1]].set(b2[0].astype(jnp.float32))
    bias_blk = bias_blk.at[2, : b3.shape[1]].set(b3[0].astype(jnp.float32))

    return jnp.concatenate([pad_w(w1), pad_w(w2), pad_w(w3), bias_blk], axis=0)


if __name__ == "__main__":
    num_inputs, num_outputs, batch = 50, 3, 8

    key = jax.random.PRNGKey(0)
    kx, kp = jax.random.split(key)
    x = jax.random.normal(kx, (batch, num_inputs), dtype=jnp.float32)
    params = make_params(kp, num_inputs, num_outputs)
    packed = pack_params(params)

    logits = mlp_forward(x, packed, (num_inputs, 30, 20, num_outputs))
    jax.block_until_ready(logits)

    # reference check in plain JAX (unpadded math)
    w1, b1, w2, b2, w3, b3 = params
    h = jnp.maximum(x @ w1 + b1, 0.0)
    h = jnp.maximum(h @ w2 + b2, 0.0)
    ref = h @ w3 + b3
    assert logits.shape == (batch, num_outputs)
    assert jnp.allclose(logits, ref, atol=1e-4, rtol=1e-4)

    print("KERNEL_OK")
</pallas_src>

<mosaic_0001>
module attributes {stable_mosaic.version = 11 : i64} {
  func.func @mlp_kernel(%arg0: i32, %arg1: memref<8x128xf32, #tpu.memory_space<vmem>>, %arg2: memref<392x128xf32, #tpu.memory_space<vmem>>, %arg3: memref<8x128xf32, #tpu.memory_space<vmem>>) attributes {dimension_semantics = [#tpu.dimension_semantics<parallel>], iteration_bounds = array<i64: 1>, scalar_prefetch = 0 : i64, scratch_operands = 0 : i64, tpu.core_type = #tpu.core_type<tc>, window_params = [{transform_indices = @transform_0, window_bounds = array<i64: 8, 128>}, {pipeline_mode = #tpu.pipeline_mode<synchronous>, transform_indices = @transform_1, window_bounds = array<i64: 392, 128>}, {transform_indices = @transform_2, window_bounds = array<i64: 8, 128>}]} {
    %c0 = arith.constant 0 : index
    %c0_0 = arith.constant 0 : index
    %0 = vector.load %arg1[%c0, %c0_0] : memref<8x128xf32, #tpu.memory_space<vmem>>, vector<8x128xf32>
    %c0_1 = arith.constant 0 : index
    %c0_2 = arith.constant 0 : index
    %1 = vector.load %arg2[%c0_1, %c0_2] : memref<392x128xf32, #tpu.memory_space<vmem>>, vector<128x128xf32>
    %c128 = arith.constant 128 : index
    %c0_3 = arith.constant 0 : index
    %2 = vector.load %arg2[%c128, %c0_3] : memref<392x128xf32, #tpu.memory_space<vmem>>, vector<128x128xf32>
    %c256 = arith.constant 256 : index
    %c0_4 = arith.constant 0 : index
    %3 = vector.load %arg2[%c256, %c0_4] : memref<392x128xf32, #tpu.memory_space<vmem>>, vector<128x128xf32>
    %c384 = arith.constant 384 : index
    %c0_5 = arith.constant 0 : index
    %4 = vector.load %arg2[%c384, %c0_5] : memref<392x128xf32, #tpu.memory_space<vmem>>, vector<8x128xf32>
    %5 = vector.extract_strided_slice %4 {offsets = [0, 0], sizes = [1, 128], strides = [1, 1]} : vector<8x128xf32> to vector<1x128xf32>
    %6 = vector.extract_strided_slice %4 {offsets = [1, 0], sizes = [1, 128], strides = [1, 1]} : vector<8x128xf32> to vector<1x128xf32>
    %7 = vector.extract_strided_slice %4 {offsets = [2, 0], sizes = [1, 128], strides = [1, 1]} : vector<8x128xf32> to vector<1x128xf32>
    %cst = arith.constant dense<0.000000e+00> : vector<8x128xf32>
    %8 = tpu.matmul %0, %1, %cst {dimension_numbers = #tpu.dot_dimension_numbers<[1], [0], [0], [1], [0, 0, 1, 1], [], []>} : vector<8x128xf32>, vector<128x128xf32>, vector<8x128xf32> -> vector<8x128xf32>
    %9 = vector.broadcast %5 : vector<1x128xf32> to vector<8x128xf32>
    %10 = arith.addf %8, %9 : vector<8x128xf32>
    %cst_6 = arith.constant 0.000000e+00 : f32
    %11 = vector.broadcast %cst_6 : f32 to vector<8x128xf32>
    %12 = arith.maximumf %10, %11 : vector<8x128xf32>
    %cst_7 = arith.constant dense<0.000000e+00> : vector<8x128xf32>
    %13 = tpu.matmul %12, %2, %cst_7 {dimension_numbers = #tpu.dot_dimension_numbers<[1], [0], [0], [1], [0, 0, 1, 1], [], []>} : vector<8x128xf32>, vector<128x128xf32>, vector<8x128xf32> -> vector<8x128xf32>
    %14 = vector.broadcast %6 : vector<1x128xf32> to vector<8x128xf32>
    %15 = arith.addf %13, %14 : vector<8x128xf32>
    %cst_8 = arith.constant 0.000000e+00 : f32
    %16 = vector.broadcast %cst_8 : f32 to vector<8x128xf32>
    %17 = arith.maximumf %15, %16 : vector<8x128xf32>
    %cst_9 = arith.constant dense<0.000000e+00> : vector<8x128xf32>
    %18 = tpu.matmul %17, %3, %cst_9 {dimension_numbers = #tpu.dot_dimension_numbers<[1], [0], [0], [1], [0, 0, 1, 1], [], []>} : vector<8x128xf32>, vector<128x128xf32>, vector<8x128xf32> -> vector<8x128xf32>
    %19 = vector.broadcast %7 : vector<1x128xf32> to vector<8x128xf32>
    %20 = arith.addf %18, %19 : vector<8x128xf32>
    %c0_10 = arith.constant 0 : index
    %c0_11 = arith.constant 0 : index
    %21 = vector.load %arg3[%c0_10, %c0_11] : memref<8x128xf32, #tpu.memory_space<vmem>>, vector<8x128xf32>
    tpu.vector_store %arg3[%c0_10, %c0_11], %20 {strides = array<i32>} : memref<8x128xf32, #tpu.memory_space<vmem>>, vector<8x128xf32>,
    return
  }
  func.func @transform_0(%arg0: i32) -> (i32, i32) {
    %c0_i32 = arith.constant 0 : i32
    %c0_i32_0 = arith.constant 0 : i32
    return %arg0, %c0_i32 : i32, i32
  }
  func.func @transform_1(%arg0: i32) -> (i32, i32) {
    %c0_i32 = arith.constant 0 : i32
    %c0_i32_0 = arith.constant 0 : i32
    %c0_i32_1 = arith.constant 0 : i32
    return %c0_i32, %c0_i32_0 : i32, i32
  }
  func.func @transform_2(%arg0: i32) -> (i32, i32) {
    %c0_i32 = arith.constant 0 : i32
    %c0_i32_0 = arith.constant 0 : i32
    return %arg0, %c0_i32 : i32, i32
  }
}

</mosaic_0001>

<bundles_post_ra>
// kernel: tpu_custom_call.1
= control target key start
LH: loop header
LB: loop body
LE: loop exit
PB: predicated region body
PF: predicated region fallthrough
CT: control target
= control target key end

     0   :  { %7 = vsyncpa [#allocation3], 0  ;;  %s643_s0 = inlined_call_operand.hbm [shape: f32[8,128], index: 0, kind: input, shape index: {}]   ;;  %s644_s1 = inlined_call_operand.hbm [shape: f32[392,128], index: 1, kind: input, shape index: {}]   ;;  %s645_s2 = inlined_call_operand.hbm [shape: f32[8,128], index: 2, kind: output, shape index: {}]  }
   0x1   :  { %8 = vsyncpa [#allocation6], 0 }
   0x2   :  { %9 = vsyncpa [#allocation4], 0  ;;  %s558_s9 = smov [#allocation2]   ;;  %s559_s11 = smov [#allocation5]  }
   0x3   :  { %s16_s10 = sshll.u32 %s558_s9, 4  ;;  %s25_s12 = sshll.u32 %s559_s11, 4  ;;  %s17_s10 = int_to_ptr.vmem [resolvable:$true] %s16_s10  ;;  %s26_s12 = int_to_ptr.vmem [resolvable:$true] %s25_s12 }
   0x4   :  { %s500_s13 = scalar_lea.vmem %s17_s10, 128  ;;  %p505_p1 = scmp.lt.s32.totalorder %s17_s10, %s17_s10 }
   0x5   :  { %p501_p0 = scmp.ne.s32.totalorder %s17_s10, %s500_s13  ;;  %p506_p2 = scmp.lt.s32.totalorder %s500_s13, %s500_s13 }
   0x7   :  { %p507_p3 = por %p506_p2, %p505_p1 }
   0x9   :  { %p508_p4 = pnand %p507_p3, %p501_p0 }
   0xb   :  { %511 = shalt.err (!%p508_p4)
}
   0xc   :  { %19 = dma.hbm_to_vmem [thread:$0]  %s643_s0, 128, %s17_s10, [#allocation3]  }
   0xd   :  { %s520_s16 = scalar_lea.vmem %s26_s12, 6272  ;;  %p525_p6 = scmp.lt.s32.totalorder %s26_s12, %s26_s12 }
   0xe   :  { %p521_p5 = scmp.ne.s32.totalorder %s26_s12, %s520_s16  ;;  %p526_p7 = scmp.lt.s32.totalorder %s520_s16, %s520_s16 }
  0x10   :  { %p527_p8 = por %p526_p7, %p525_p6 }
  0x12   :  { %p528_p9 = pnand %p527_p8, %p521_p5 }
  0x14   :  { %531 = shalt.err (!%p528_p9)
}
  0x15   :  { %s560_s17 = smov 128   ;;  %s561_s18 = smov 8  }
  0x16   :  { %31 = dma.hbm_to_vmem [thread:$0]  %s644_s1, 6272, %s26_s12, [#allocation6], %s560_s17, %s560_s17, %s561_s18  }
  0x17   :  { %552 = dma.done.wait [#allocation3], 128  }
  0x18   :  { %553 = vsyncadd [#allocation3], 4294967168 }
  0x19   :  { %554 = dma.done.wait [#allocation6], 6272  }
  0x1a   :  { %555 = vsyncadd [#allocation6], 4294961024  ;;  %v562_v0 = vmov 0.0   ;;  %vm563_vm0 = vmmov 0   ;;  %v54_v1 = vld [vmem:[#allocation5 + $0x78] sm:$0xff]  ;;  %v53_v2 = vld [vmem:[#allocation5 + $0x70] sm:$0xff]  ;;  %v88_v47 = vlaneseq }
  0x1b   :  { %380 = vmatprep.subr.mxu0 %v562_v0  ;;  %412 = vmatprep.mubr.msk.f32.mxu0 %vm563_vm0, %v562_v0  ;;  %v52_v3 = vld [vmem:[#allocation5 + $0x68] sm:$0xff]  ;;  %v51_v4 = vld [vmem:[#allocation5 + $0x60] sm:$0xff]  ;;  %v70_v5 = vld [vmem:[#allocation5 + $0xf8] sm:$0xff]  ;;  %s564_s0 = smov [#allocation7]  }
  0x1c   :  { %415 = vmatprep.subr.mxu1 %v562_v0  ;;  %447 = vmatprep.mubr.msk.f32.mxu1 %vm563_vm0, %v562_v0  ;;  %v50_v6 = vld [vmem:[#allocation5 + $0x58] sm:$0xff]  ;;  %v69_v7 = vld [vmem:[#allocation5 + $0xf0] sm:$0xff]  ;;  %v68_v8 = vld [vmem:[#allocation5 + $0xe8] sm:$0xff]  ;;  %v89_v48 = vshrl.u32 %v88_v47, 7  ;;  %s319_s1 = sshll.u32 %s564_s0, 4  ;;  %s320_s1 = int_to_ptr.vmem [resolvable:$true] %s319_s1 }
  0x1d   :  { %381 = vmatpush3.msra.mxu0 %v54_v1  ;;  %416 = vmatpush3.msra.mxu1 %v70_v5  ;;  %v49_v9 = vld [vmem:[#allocation5 + $0x50] sm:$0xff]  ;;  %v67_v10 = vld [vmem:[#allocation5 + $0xe0] sm:$0xff]  ;;  %v48_v11 = vld [vmem:[#allocation5 + $0x48] sm:$0xff]  ;;  %s532_s21 = scalar_lea.vmem %s320_s1, 128  ;;  %p537_p11 = scmp.lt.s32.totalorder %s320_s1, %s320_s1 }
  0x1e   :  { %382 = vmatprep.subr.mxu0 %v562_v0  ;;  %417 = vmatprep.subr.mxu1 %v562_v0  ;;  %v66_v12 = vld [vmem:[#allocation5 + $0xd8] sm:$0xff]  ;;  %v47_v13 = vld [vmem:[#allocation5 + $0x40] sm:$0xff]  ;;  %v65_v14 = vld [vmem:[#allocation5 + $0xd0] sm:$0xff]  ;;  %v90_v49 = vsub.s32 0, %v89_v48  ;;  %v165_v59 = vsub.s32 1, %v89_v48  ;;  %p533_p10 = scmp.ne.s32.totalorder %s320_s1, %s532_s21  ;;  %p538_p12 = scmp.lt.s32.totalorder %s532_s21, %s532_s21 }
  0x1f   :  { %383 = vmatpush3.msra.mxu0 %v53_v2  ;;  %418 = vmatpush3.msra.mxu1 %v69_v7  ;;  %v46_v15 = vld [vmem:[#allocation5 + $0x38] sm:$0xff]  ;;  %v64_v16 = vld [vmem:[#allocation5 + $0xc8] sm:$0xff]  ;;  %v45_v17 = vld [vmem:[#allocation5 + $0x30] sm:$0xff]  ;;  %v240_v2 = vsub.s32 2, %v89_v48 }
  0x20   :  { %384 = vmatprep.subr.mxu0 %v562_v0  ;;  %419 = vmatprep.subr.mxu1 %v562_v0  ;;  %v63_v18 = vld [vmem:[#allocation5 + $0xc0] sm:$0xff]  ;;  %v44_v19 = vld [vmem:[#allocation5 + $0x28] sm:$0xff]  ;;  %v62_v20 = vld [vmem:[#allocation5 + $0xb8] sm:$0xff]  ;;  %p539_p13 = por %p538_p12, %p537_p11 }
  0x21   :  { %385 = vmatpush3.msra.mxu0 %v52_v3  ;;  %420 = vmatpush3.msra.mxu1 %v68_v8  ;;  %v43_v21 = vld [vmem:[#allocation5 + $0x20] sm:$0xff]  ;;  %v61_v22 = vld [vmem:[#allocation5 + $0xb0] sm:$0xff]  ;;  %v42_v23 = vld [vmem:[#allocation5 + $0x18] sm:$0xff] }
  0x22   :  { %386 = vmatprep.subr.mxu0 %v562_v0  ;;  %421 = vmatprep.subr.mxu1 %v562_v0  ;;  %v60_v24 = vld [vmem:[#allocation5 + $0xa8] sm:$0xff]  ;;  %v41_v25 = vld [vmem:[#allocation5 + $0x10] sm:$0xff]  ;;  %v59_v26 = vld [vmem:[#allocation5 + $0xa0] sm:$0xff]  ;;  %p540_p0 = pnand %p539_p13, %p533_p10 }
  0x23   :  { %387 = vmatpush3.msra.mxu0 %v51_v4  ;;  %422 = vmatpush3.msra.mxu1 %v67_v10  ;;  %v40_v27 = vld [vmem:[#allocation5 + $0x8] sm:$0xff]  ;;  %v58_v28 = vld [vmem:[#allocation5 + $0x98] sm:$0xff]  ;;  %v39_v29 = vld [vmem:[#allocation5] sm:$0xff] }
  0x24   :  { %388 = vmatprep.subr.mxu0 %v562_v0  ;;  %423 = vmatprep.subr.mxu1 %v562_v0  ;;  %v38_v30 = vld [vmem:[#allocation2] sm:$0xff]  ;;  %v57_v31 = vld [vmem:[#allocation5 + $0x90] sm:$0xff]  ;;  %v56_v32 = vld [vmem:[#allocation5 + $0x88] sm:$0xff] }
  0x25   :  { %389 = vmatpush3.msra.mxu0 %v50_v6  ;;  %424 = vmatpush3.msra.mxu1 %v66_v12  ;;  %v55_v33 = vld [vmem:[#allocation5 + $0x80] sm:$0xff]  ;;  %v86_v34 = vld [vmem:[#allocation5 + $0x178] sm:$0xff]  ;;  %v85_v35 = vld [vmem:[#allocation5 + $0x170] sm:$0xff] }
  0x26   :  { %390 = vmatprep.subr.mxu0 %v562_v0  ;;  %425 = vmatprep.subr.mxu1 %v562_v0  ;;  %v84_v36 = vld [vmem:[#allocation5 + $0x168] sm:$0xff]  ;;  %v83_v37 = vld [vmem:[#allocation5 + $0x160] sm:$0xff]  ;;  %v82_v38 = vld [vmem:[#allocation5 + $0x158] sm:$0xff] }
  0x27   :  { %391 = vmatpush3.msra.mxu0 %v49_v9  ;;  %426 = vmatpush3.msra.mxu1 %v65_v14  ;;  %v81_v39 = vld [vmem:[#allocation5 + $0x150] sm:$0xff]  ;;  %v80_v40 = vld [vmem:[#allocation5 + $0x148] sm:$0xff]  ;;  %v79_v41 = vld [vmem:[#allocation5 + $0x140] sm:$0xff] }
  0x28   :  { %392 = vmatprep.subr.mxu0 %v562_v0  ;;  %427 = vmatprep.subr.mxu1 %v562_v0  ;;  %v78_v42 = vld [vmem:[#allocation5 + $0x138] sm:$0xff]  ;;  %v77_v43 = vld [vmem:[#allocation5 + $0x130] sm:$0xff]  ;;  %v76_v44 = vld [vmem:[#allocation5 + $0x128] sm:$0xff] }
  0x29   :  { %393 = vmatpush3.msra.mxu0 %v48_v11  ;;  %428 = vmatpush3.msra.mxu1 %v64_v16  ;;  %v75_v45 = vld [vmem:[#allocation5 + $0x120] sm:$0xff]  ;;  %v74_v46 = vld [vmem:[#allocation5 + $0x118] sm:$0xff]  ;;  %v73_v56 = vld [vmem:[#allocation5 + $0x110] sm:$0xff] }
  0x2a   :  { %394 = vmatprep.subr.mxu0 %v562_v0  ;;  %429 = vmatprep.subr.mxu1 %v562_v0  ;;  %v87_v50 = vld [vmem:[#allocation5 + $0x180] sm:$0xff]  ;;  %v72_v57 = vld [vmem:[#allocation5 + $0x108] sm:$0xff] }
  0x2b   :  { %395 = vmatpush3.msra.mxu0 %v47_v13  ;;  %430 = vmatpush3.msra.mxu1 %v63_v18  ;;  %v91_v51 = vrot.slane %v87_v50, %v90_v49  ;;  %v71_v58 = vld [vmem:[#allocation5 + $0x100] sm:$0xff]  ;;  %v166_v60 = vrot.slane %v87_v50, %v165_v59  ;;  %v241_v3 = vrot.slane %v87_v50, %v240_v2 }
  0x2c   :  { %396 = vmatprep.subr.mxu0 %v562_v0  ;;  %431 = vmatprep.subr.mxu1 %v562_v0 }
  0x2d   :  { %397 = vmatpush3.msra.mxu0 %v46_v15  ;;  %432 = vmatpush3.msra.mxu1 %v62_v20 }
  0x2e   :  { %398 = vmatprep.subr.mxu0 %v562_v0  ;;  %433 = vmatprep.subr.mxu1 %v562_v0 }
  0x2f   :  { %399 = vmatpush3.msra.mxu0 %v45_v17  ;;  %434 = vmatpush3.msra.mxu1 %v61_v22 }
  0x30   :  { %400 = vmatprep.subr.mxu0 %v562_v0  ;;  %435 = vmatprep.subr.mxu1 %v562_v0 }
  0x31   :  { %401 = vmatpush3.msra.mxu0 %v44_v19  ;;  %436 = vmatpush3.msra.mxu1 %v60_v24 }
  0x32   :  { %402 = vmatprep.subr.mxu0 %v562_v0  ;;  %437 = vmatprep.subr.mxu1 %v562_v0 }
  0x33   :  { %403 = vmatpush3.msra.mxu0 %v43_v21  ;;  %438 = vmatpush3.msra.mxu1 %v59_v26 }
  0x34   :  { %404 = vmatprep.subr.mxu0 %v562_v0  ;;  %439 = vmatprep.subr.mxu1 %v562_v0 }
  0x35   :  { %405 = vmatpush3.msra.mxu0 %v42_v23  ;;  %440 = vmatpush3.msra.mxu1 %v58_v28 }
  0x36   :  { %406 = vmatprep.subr.mxu0 %v562_v0  ;;  %441 = vmatprep.subr.mxu1 %v562_v0 }
  0x37   :  { %407 = vmatpush3.msra.mxu0 %v41_v25  ;;  %442 = vmatpush3.msra.mxu1 %v57_v31 }
  0x38   :  { %408 = vmatprep.subr.mxu0 %v562_v0  ;;  %443 = vmatprep.subr.mxu1 %v562_v0 }
  0x39   :  { %409 = vmatpush3.msra.mxu0 %v40_v27  ;;  %444 = vmatpush3.msra.mxu1 %v56_v32 }
  0x3a   :  { %410 = vmatprep.subr.mxu0 %v562_v0  ;;  %445 = vmatprep.subr.mxu1 %v562_v0 }
  0x3b   :  { %411 = vmatpush3.msra.mxu0 %v39_v29  ;;  %446 = vmatpush3.msra.mxu1 %v55_v33 }
  0x3c   :  { %413 = vmatmul.mubr.f32.vlgmr.msra.gmra.mxu0 %v38_v30  ;;  %450 = vmatprep.subr.mxu0 %v562_v0 }
  0x3d   :  { %482 = vmatprep.mubr.msk.f32.mxu0 %vm563_vm0, %v562_v0  ;;  %451 = vmatpush3.msra.mxu0 %v86_v34 }
  0x3e   :  { %452 = vmatprep.subr.mxu0 %v562_v0 }
  0x3f   :  { %453 = vmatpush3.msra.mxu0 %v85_v35 }
  0x40   :  { %454 = vmatprep.subr.mxu0 %v562_v0 }
  0x41   :  { %455 = vmatpush3.msra.mxu0 %v84_v36 }
  0x42   :  { %456 = vmatprep.subr.mxu0 %v562_v0 }
  0x43   :  { %457 = vmatpush3.msra.mxu0 %v83_v37 }
  0x44   :  { %458 = vmatprep.subr.mxu0 %v562_v0 }
  0x45   :  { %459 = vmatpush3.msra.mxu0 %v82_v38 }
  0x46   :  { %460 = vmatprep.subr.mxu0 %v562_v0 }
  0x47   :  { %461 = vmatpush3.msra.mxu0 %v81_v39 }
  0x48   :  { %462 = vmatprep.subr.mxu0 %v562_v0 }
  0x49   :  { %463 = vmatpush3.msra.mxu0 %v80_v40 }
  0x4a   :  { %464 = vmatprep.subr.mxu0 %v562_v0 }
  0x4b   :  { %465 = vmatpush3.msra.mxu0 %v79_v41 }
  0x4c   :  { %466 = vmatprep.subr.mxu0 %v562_v0 }
  0x4d   :  { %467 = vmatpush3.msra.mxu0 %v78_v42 }
  0x4e   :  { %468 = vmatprep.subr.mxu0 %v562_v0 }
  0x4f   :  { %469 = vmatpush3.msra.mxu0 %v77_v43 }
  0x50   :  { %470 = vmatprep.subr.mxu0 %v562_v0 }
  0x51   :  { %471 = vmatpush3.msra.mxu0 %v76_v44 }
  0x52   :  { %472 = vmatprep.subr.mxu0 %v562_v0 }
  0x53   :  { %473 = vmatpush3.msra.mxu0 %v75_v45 }
  0x54   :  { %474 = vmatprep.subr.mxu0 %v562_v0 }
  0x55   :  { %475 = vmatpush3.msra.mxu0 %v74_v46 }
  0x56   :  { %476 = vmatprep.subr.mxu0 %v562_v0 }
  0x57   :  { %477 = vmatpush3.msra.mxu0 %v73_v56 }
  0x58   :  { %478 = vmatprep.subr.mxu0 %v562_v0 }
  0x59   :  { %479 = vmatpush3.msra.mxu0 %v72_v57 }
  0x5a   :  { %480 = vmatprep.subr.mxu0 %v562_v0 }
  0x5b   :  { %481 = vmatpush3.msra.mxu0 %v71_v58 }
  0xfc   :  { %v158_v52 = vpop.f32.mrf.mxu0 }
  0xfd   :  { %v159_v53 = vadd.f32 %v158_v52, %v91_v51 }
  0xfe   :  { %v414_v54 = vpop.f32.mrf.mxu0 }
  0xff   :  { %v162_v55 = vmax.f32 %v159_v53, 0.0 }
 0x101   :  { %448 = vmatmul.mubr.f32.vlgmr.msra.gmra.mxu1 %v162_v55 }
 0x1c1   :  { %v233_v61 = vpop.f32.mrf.mxu1 }
 0x1c2   :  { %v234_v62 = vadd.f32 %v233_v61, %v166_v60 }
 0x1c3   :  { %v449_v63 = vpop.f32.mrf.mxu1 }
 0x1c4   :  { %v237_v1 = vmax.f32 %v234_v62, 0.0 }
 0x1c6   :  { %483 = vmatmul.mubr.f32.vlgmr.msra.gmra.mxu0 %v237_v1 }
 0x286   :  { %v308_v4 = vpop.f32.mrf.mxu0 }
 0x287   :  { %v309_v5 = vadd.f32 %v308_v4, %v241_v3 }
 0x288   :  { %v484_v6 = vpop.f32.mrf.mxu0 }
 0x289   :  { %312 = vst [vmem:[#allocation7] sm:$0xff] %v309_v5 }
 0x28a   :  { %543 = shalt.err (!%p540_p0)
}
 0x28b   :  { %322 = dma.vmem_to_hbm [thread:$0]  %s320_s1, 128, %s645_s2, [#allocation4]  }
 0x28c   :  { %556 = dma.done.wait [#allocation4], 128  }
 0x28d   :  { %557 = vsyncadd [#allocation4], 4294967168 }
 0x28e   :  { %326 = vsyncpa [#allocation3], 1 }
 0x28f   :  { %327 = vsyncpa [#allocation6], 1 }
 0x290   :  { %328 = vsyncpa [#allocation4], 1 }

</bundles_post_ra>
